<compile_context>
chip_gen: v7x
topology: tpu7x:2x2x1
jax: 0.10.0
libtpu: 0.0.40
codegen_flags: <defaults>
</compile_context>

<pallas_src>
import math
import jax
import jax.numpy as jnp
from jax.experimental import pallas as pl
from jax.experimental.pallas import tpu as pltpu


def _round_up(v, m):
    return ((v + m - 1) // m) * m


# ---------------------------------------------------------------------------
# Kernels: canonical LHS(M,K) x RHS(K,N) MXU matmul, f32 VMEM accumulator,
# init / bias-add + cast epilogue gated with pl.when on the K grid axis.
# ---------------------------------------------------------------------------
def _linear_bias_kernel(x_ref, w_ref, b_ref, o_ref, acc_ref):
    k = pl.program_id(2)

    @pl.when(k == 0)
    def _():
        acc_ref[...] = jnp.zeros_like(acc_ref)

    acc_ref[...] += jnp.dot(
        x_ref[...], w_ref[...], preferred_element_type=jnp.float32
    )

    @pl.when(k == pl.num_programs(2) - 1)
    def _():
        o_ref[...] = (acc_ref[...] + b_ref[...]).astype(o_ref.dtype)


def _linear_nobias_kernel(x_ref, w_ref, o_ref, acc_ref):
    k = pl.program_id(2)

    @pl.when(k == 0)
    def _():
        acc_ref[...] = jnp.zeros_like(acc_ref)

    acc_ref[...] += jnp.dot(
        x_ref[...], w_ref[...], preferred_element_type=jnp.float32
    )

    @pl.when(k == pl.num_programs(2) - 1)
    def _():
        o_ref[...] = acc_ref[...].astype(o_ref.dtype)


# ---------------------------------------------------------------------------
# Per-generation tile / VMEM defaults.
# ---------------------------------------------------------------------------
def _tpu_generation():
    try:
        kind = jax.devices()[0].device_kind.lower()
    except Exception:
        return None
    if "v7" in kind:
        return "v7x"
    if "v6" in kind:
        return "v6e"
    if "v5 lite" in kind or "v5e" in kind or "v5lite" in kind:
        return "v5e"
    return None


# (tm, tn, tk, vmem_cap_bytes)
_TILE_DEFAULTS = {
    # v5e ridge ~240 F/B; big tk amortizes the f32 acc RMW against the 1 vst slot.
    "v5e": (512, 512, 2048, 100 << 20),
    # v6e ridge ~650-700 F/B -> ~1k-square tiles; 128 MiB physical VMEM.
    "v6e": (1024, 1024, 1024, 100 << 20),
    # v7x ridge ~310 F/B; 64 MiB/TC VMEM -> keep the budget modest.
    "v7x": (512, 512, 1024, 48 << 20),
    None: (512, 512, 1024, 48 << 20),
}


def _gen_defaults():
    return _TILE_DEFAULTS.get(_tpu_generation(), _TILE_DEFAULTS[None])


# ---------------------------------------------------------------------------
# Core pallas_call.
# ---------------------------------------------------------------------------
def _linear_pallas_call(x2d, w_kn, bias2d, out_dtype, tm, tn, tk, vmem_cap):
    Mp, Kp = x2d.shape
    _, Np = w_kn.shape
    grid = (Mp // tm, Np // tn, Kp // tk)

    in_bytes = jnp.dtype(x2d.dtype).itemsize
    out_bytes = jnp.dtype(out_dtype).itemsize
    vmem_needed = (
        2 * (tm * tk + tk * tn) * in_bytes   # double-buffered x / W tiles
        + 2 * tm * tn * out_bytes            # double-buffered output tile
        + tm * tn * 4                        # f32 accumulator
        + 2 * tn * 4                         # bias tile
    )
    vmem_limit = int(min(max(vmem_needed + (8 << 20), 32 << 20), vmem_cap))

    if bias2d is not None:
        kernel = _linear_bias_kernel
        in_specs = [
            pl.BlockSpec((tm, tk), lambda i, j, k: (i, k)),   # x tile
            pl.BlockSpec((tk, tn), lambda i, j, k: (k, j)),   # W^T tile (K, N)
            pl.BlockSpec((1, tn), lambda i, j, k: (0, j)),    # f32 bias tile
        ]
        operands = (x2d, w_kn, bias2d)
    else:
        kernel = _linear_nobias_kernel
        in_specs = [
            pl.BlockSpec((tm, tk), lambda i, j, k: (i, k)),
            pl.BlockSpec((tk, tn), lambda i, j, k: (k, j)),
        ]
        operands = (x2d, w_kn)

    return pl.pallas_call(
        kernel,
        out_shape=jax.ShapeDtypeStruct((Mp, Np), out_dtype),
        grid_spec=pltpu.PrefetchScalarGridSpec(
            num_scalar_prefetch=0,
            grid=grid,
            in_specs=in_specs,
            out_specs=pl.BlockSpec((tm, tn), lambda i, j, k: (i, j)),
            scratch_shapes=[pltpu.VMEM((tm, tn), jnp.float32)],
        ),
        compiler_params=pltpu.CompilerParams(
            dimension_semantics=("parallel", "parallel", "arbitrary"),
            vmem_limit_bytes=vmem_limit,
        ),
    )(*operands)


# ---------------------------------------------------------------------------
# Parameter preparation (hoisted out of the per-call hot path).
# ---------------------------------------------------------------------------
def prepare_nn_linear_params(weight_mean, bias_mean=None, *,
                             compute_dtype=jnp.bfloat16, tn=None, tk=None):
    """One-time cast + (K,N) transpose + pad of the weight/bias."""
    d_tm, d_tn, d_tk, vmem_cap = _gen_defaults()
    tn = d_tn if tn is None else tn
    tk = d_tk if tk is None else tk

    out_f, in_f = weight_mean.shape
    tn_eff = min(tn, _round_up(out_f, 128))   # lane dim: multiple of 128
    tk_eff = min(tk, _round_up(in_f, 128))    # lane dim: multiple of 128
    Np = _round_up(out_f, tn_eff)
    Kp = _round_up(in_f, tk_eff)

    w_kn = weight_mean.astype(compute_dtype).T   # (in_f, out_f)
    if (Kp != in_f) or (Np != out_f):
        w_kn = jnp.pad(w_kn, ((0, Kp - in_f), (0, Np - out_f)))

    bias2d = None
    if bias_mean is not None:
        bias2d = bias_mean.astype(jnp.float32).reshape(1, out_f)
        if Np != out_f:
            bias2d = jnp.pad(bias2d, ((0, 0), (0, Np - out_f)))

    return dict(
        w_kn=w_kn, bias2d=bias2d, out_f=out_f, in_f=in_f,
        tn_eff=tn_eff, tk_eff=tk_eff, Np=Np, Kp=Kp,
        compute_dtype=compute_dtype, tm_default=d_tm, vmem_cap=vmem_cap,
    )


def nn_linear_forward_prepared(x, prep, *, tm=None):
    out_f, in_f = prep["out_f"], prep["in_f"]
    assert x.shape[-1] == in_f
    out_dtype = x.dtype
    lead = x.shape[:-1]
    x2d = x.reshape(-1, in_f)
    M = x2d.shape[0]

    tm = prep["tm_default"] if tm is None else tm
    tm_eff = min(tm, _round_up(max(M, 1), 8))    # sublane dim: multiple of 8
    Mp = _round_up(M, tm_eff)

    x2d = x2d.astype(prep["compute_dtype"])
    if (Mp != M) or (prep["Kp"] != in_f):
        x2d = jnp.pad(x2d, ((0, Mp - M), (0, prep["Kp"] - in_f)))

    out = _linear_pallas_call(
        x2d, prep["w_kn"], prep["bias2d"], out_dtype,
        tm_eff, prep["tn_eff"], prep["tk_eff"], prep["vmem_cap"],
    )
    if (Mp != M) or (prep["Np"] != out_f):
        out = out[:M, :out_f]
    return out.reshape(*lead, out_f)


def make_nn_linear(weight_mean, bias_mean=None, *, compute_dtype=jnp.bfloat16,
                   tm=None, tn=None, tk=None):
    """Returns forward(x) with the padded / cast / transposed weight cached."""
    prep = prepare_nn_linear_params(
        weight_mean, bias_mean, compute_dtype=compute_dtype, tn=tn, tk=tk
    )

    def forward(x):
        return nn_linear_forward_prepared(x, prep, tm=tm)

    return forward


def nn_linear_forward(x, weight_mean, bias_mean=None, *,
                      compute_dtype=jnp.bfloat16, tm=None, tn=None, tk=None,
                      force_pallas=False):
    """Pallas implementation of F.linear(x, weight_mean, bias_mean).

    compute_dtype: dtype fed to the MXU (default bf16; accumulation is f32).
    Output dtype matches x.dtype.
    """
    out_f, in_f = weight_mean.shape
    assert x.shape[-1] == in_f
    M = math.prod(x.shape[:-1]) if x.shape[:-1] else 1

    # Small-problem fast path: for sub-tile problems the pallas_call fixed
    # overhead and the pad/cast/slice wrapper ops dominate -> use XLA's dot.
    if (not force_pallas) and (M * out_f * in_f < 256 * 256 * 256):
        y = jnp.dot(x, weight_mean.T, preferred_element_type=jnp.float32)
        if bias_mean is not None:
            y = y + bias_mean.astype(jnp.float32)
        return y.astype(x.dtype)

    # Megacore heuristic: if M fits a single tile and N would too, split N so
    # the v7x second TensorCore gets a parallel grid axis of extent >= 2.
    d_tm, d_tn, d_tk, _ = _gen_defaults()
    tm_req = d_tm if tm is None else tm
    tn_req = d_tn if tn is None else tn
    if tn is None and M <= tm_req and 256 < out_f <= tn_req:
        tn_req = max(128, _round_up(pl.cdiv(out_f, 2), 128))

    prep = prepare_nn_linear_params(
        weight_mean, bias_mean, compute_dtype=compute_dtype, tn=tn_req, tk=tk
    )
    return nn_linear_forward_prepared(x, prep, tm=tm)


def init_nn_linear_params(key, in_features, out_features, bias=True,
                          dtype=jnp.float32):
    """Init matching nnLinear.reset_parameters:
       uniform(-1/sqrt(in_features), +1/sqrt(in_features))."""
    bound = 1.0 / math.sqrt(in_features)
    kw, kb = jax.random.split(key)
    weight_mean = jax.random.uniform(
        kw, (out_features, in_features), dtype=dtype, minval=-bound, maxval=bound
    )
    bias_mean = None
    if bias:
        bias_mean = jax.random.uniform(
            kb, (out_features,), dtype=dtype, minval=-bound, maxval=bound
        )
    return weight_mean, bias_mean


# TODO(synk): kl_divergence() and the prior buffers are training-time-only and
# not part of the forward pass; they are not implemented as kernels.

if __name__ == "__main__":
    key = jax.random.PRNGKey(0)
    k_x, k_p = jax.random.split(key)

    batch, seq, in_features, out_features = 2, 8, 32, 64

    x = jax.random.normal(k_x, (batch, seq, in_features), dtype=jnp.float32)
    weight_mean, bias_mean = init_nn_linear_params(
        k_p, in_features, out_features, bias=True, dtype=jnp.float32
    )

    # Reference (same math as F.linear).
    y_ref = x @ weight_mean.T + bias_mean

    # f32 MXU path (tight tolerance), forcing the Pallas kernel at small shapes.
    y_f32 = nn_linear_forward(
        x, weight_mean, bias_mean, compute_dtype=jnp.float32, force_pallas=True
    )
    y_f32 = jax.block_until_ready(y_f32)
    assert y_f32.shape == (batch, seq, out_features)
    assert jnp.allclose(y_f32, y_ref, atol=1e-5, rtol=1e-5)

    # Default bf16 MXU path with the weight pad/cast/transpose hoisted out of
    # the per-call path (recommended mode on v6e/v7x).
    fwd = make_nn_linear(weight_mean, bias_mean)
    y_bf16 = jax.block_until_ready(fwd(x))
    assert y_bf16.shape == (batch, seq, out_features)
    assert jnp.allclose(y_bf16, y_ref, atol=3e-2, rtol=3e-2)

    # No-bias kernel variant.
    y_nb = nn_linear_forward(
        x, weight_mean, None, compute_dtype=jnp.float32, force_pallas=True
    )
    y_nb = jax.block_until_ready(y_nb)
    assert jnp.allclose(y_nb, x @ weight_mean.T, atol=1e-5, rtol=1e-5)

    print("KERNEL_OK")
</pallas_src>

<mosaic_0001>
module attributes {stable_mosaic.version = 11 : i64} {
  func.func @_linear_bias_kernel(%arg0: i32, %arg1: i32, %arg2: i32, %arg3: memref<16x128xf32, #tpu.memory_space<vmem>>, %arg4: memref<128x128xf32, #tpu.memory_space<vmem>>, %arg5: memref<1x128xf32, #tpu.memory_space<vmem>>, %arg6: memref<16x128xf32, #tpu.memory_space<vmem>>, %arg7: memref<16x128xf32, #tpu.memory_space<vmem>>) attributes {dimension_semantics = [#tpu.dimension_semantics<parallel>, #tpu.dimension_semantics<parallel>, #tpu.dimension_semantics<arbitrary>], iteration_bounds = array<i64: 1, 1, 1>, scalar_prefetch = 0 : i64, scratch_operands = 1 : i64, tpu.core_type = #tpu.core_type<tc>, window_params = [{transform_indices = @transform_0, window_bounds = array<i64: 16, 128>}, {transform_indices = @transform_1, window_bounds = array<i64: 128, 128>}, {transform_indices = @transform_2, window_bounds = array<i64: 1, 128>}, {transform_indices = @transform_3, window_bounds = array<i64: 16, 128>}]} {
    %c0_i32 = arith.constant 0 : i32
    %0 = arith.cmpi eq, %arg2, %c0_i32 : i32
    %1 = arith.extui %0 : i1 to i32
    %c0_i32_0 = arith.constant 0 : i32
    %2 = arith.cmpi ne, %1, %c0_i32_0 : i32
    scf.if %2 {
      %cst_10 = arith.constant 0.000000e+00 : f32
      %12 = vector.broadcast %cst_10 : f32 to vector<16x128xf32>
      %c0_11 = arith.constant 0 : index
      %c0_12 = arith.constant 0 : index
      %13 = vector.load %arg7[%c0_11, %c0_12] : memref<16x128xf32, #tpu.memory_space<vmem>>, vector<16x128xf32>
      tpu.vector_store %arg7[%c0_11, %c0_12], %12 {strides = array<i32>} : memref<16x128xf32, #tpu.memory_space<vmem>>, vector<16x128xf32>,
    } else {
    }
    %c0 = arith.constant 0 : index
    %c0_1 = arith.constant 0 : index
    %3 = vector.load %arg7[%c0, %c0_1] : memref<16x128xf32, #tpu.memory_space<vmem>>, vector<16x128xf32>
    %c0_2 = arith.constant 0 : index
    %c0_3 = arith.constant 0 : index
    %4 = vector.load %arg3[%c0_2, %c0_3] : memref<16x128xf32, #tpu.memory_space<vmem>>, vector<16x128xf32>
    %c0_4 = arith.constant 0 : index
    %c0_5 = arith.constant 0 : index
    %5 = vector.load %arg4[%c0_4, %c0_5] : memref<128x128xf32, #tpu.memory_space<vmem>>, vector<128x128xf32>
    %cst = arith.constant dense<0.000000e+00> : vector<16x128xf32>
    %6 = tpu.matmul %4, %5, %cst {dimension_numbers = #tpu.dot_dimension_numbers<[1], [0], [0], [1], [0, 0, 1, 1], [], []>} : vector<16x128xf32>, vector<128x128xf32>, vector<16x128xf32> -> vector<16x128xf32>
    %7 = arith.addf %3, %6 : vector<16x128xf32>
    %c0_6 = arith.constant 0 : index
    %c0_7 = arith.constant 0 : index
    %8 = vector.load %arg7[%c0_6, %c0_7] : memref<16x128xf32, #tpu.memory_space<vmem>>, vector<16x128xf32>
    tpu.vector_store %arg7[%c0_6, %c0_7], %7 {strides = array<i32>} : memref<16x128xf32, #tpu.memory_space<vmem>>, vector<16x128xf32>,
    %c0_i32_8 = arith.constant 0 : i32
    %9 = arith.cmpi eq, %arg2, %c0_i32_8 : i32
    %10 = arith.extui %9 : i1 to i32
    %c0_i32_9 = arith.constant 0 : i32
    %11 = arith.cmpi ne, %10, %c0_i32_9 : i32
    scf.if %11 {
      %c0_10 = arith.constant 0 : index
      %c0_11 = arith.constant 0 : index
      %12 = vector.load %arg7[%c0_10, %c0_11] : memref<16x128xf32, #tpu.memory_space<vmem>>, vector<16x128xf32>
      %c0_12 = arith.constant 0 : index
      %c0_13 = arith.constant 0 : index
      %13 = vector.load %arg5[%c0_12, %c0_13] : memref<1x128xf32, #tpu.memory_space<vmem>>, vector<1x128xf32>
      %14 = vector.broadcast %13 : vector<1x128xf32> to vector<16x128xf32>
      %15 = arith.addf %12, %14 : vector<16x128xf32>
      %c0_14 = arith.constant 0 : index
      %c0_15 = arith.constant 0 : index
      %16 = vector.load %arg6[%c0_14, %c0_15] : memref<16x128xf32, #tpu.memory_space<vmem>>, vector<16x128xf32>
      tpu.vector_store %arg6[%c0_14, %c0_15], %15 {strides = array<i32>} : memref<16x128xf32, #tpu.memory_space<vmem>>, vector<16x128xf32>,
    } else {
    }
    return
  }
  func.func @transform_0(%arg0: i32, %arg1: i32, %arg2: i32) -> (i32, i32) {
    %c0_i32 = arith.constant 0 : i32
    return %arg0, %arg2 : i32, i32
  }
  func.func @transform_1(%arg0: i32, %arg1: i32, %arg2: i32) -> (i32, i32) {
    %c0_i32 = arith.constant 0 : i32
    return %arg2, %arg1 : i32, i32
  }
  func.func @transform_2(%arg0: i32, %arg1: i32, %arg2: i32) -> (i32, i32) {
    %c0_i32 = arith.constant 0 : i32
    %c0_i32_0 = arith.constant 0 : i32
    return %c0_i32, %arg1 : i32, i32
  }
  func.func @transform_3(%arg0: i32, %arg1: i32, %arg2: i32) -> (i32, i32) {
    %c0_i32 = arith.constant 0 : i32
    return %arg0, %arg1 : i32, i32
  }
}

</mosaic_0001>

<bundles_post_ra>
// kernel: tpu_custom_call.1
= control target key start
LH: loop header
LB: loop body
LE: loop exit
PB: predicated region body
PF: predicated region fallthrough
CT: control target
= control target key end

     0   :  { %8 = vsyncpa [#allocation4], 0  ;;  %s418_s0 = inlined_call_operand.hbm [shape: f32[16,128], index: 0, kind: input, shape index: {}]   ;;  %s419_s1 = inlined_call_operand.hbm [shape: f32[128,128], index: 1, kind: input, shape index: {}]   ;;  %s420_s2 = inlined_call_operand.vmem [shape: f32[1,128], index: 2, kind: input, shape index: {}]   ;;  %s421_s3 = inlined_call_operand.hbm [shape: f32[16,128], index: 3, kind: output, shape index: {}]  }
   0x1   :  { %9 = vsyncpa [#allocation7], 0 }
   0x2   :  { %10 = vsyncpa [#allocation5], 0  ;;  %s345_s12 = smov [#allocation3]   ;;  %s273_s16 = scalar_lea.hbm %s418_s0, 256 }
   0x3   :  { %s16_s13 = sshll.u32 %s345_s12, 4  ;;  %p274_p0 = scmp.ne.s32.totalorder %s418_s0, %s273_s16  ;;  %s17_s13 = int_to_ptr.vmem [resolvable:$true] %s16_s13 }
   0x4   :  { %p277_p1 = scmp.lt.u32.totalorder %s273_s16, %s418_s0 }
   0x6   :  { %p279_p2 = pnand %p277_p1, %p274_p0 }
   0x8   :  { %282 = shalt.err (!%p279_p2)
}
   0x9   :  { %s283_s21 = scalar_lea.vmem %s17_s13, 256  ;;  %p288_p4 = scmp.lt.s32.totalorder %s17_s13, %s17_s13 }
   0xa   :  { %p284_p3 = scmp.ne.s32.totalorder %s17_s13, %s283_s21  ;;  %p289_p5 = scmp.lt.s32.totalorder %s283_s21, %s283_s21 }
   0xc   :  { %p290_p6 = por %p289_p5, %p288_p4 }
   0xe   :  { %p291_p7 = pnand %p290_p6, %p284_p3 }
  0x10   :  { %294 = shalt.err (!%p291_p7)
}
  0x11   :  { %s346_s22 = smov 128   ;;  %s347_s23 = smov 8  }
  0x12   :  { %22 = dma.hbm_to_vmem [thread:$0]  %s418_s0, 256, %s17_s13, [#allocation4], %s346_s22, %s346_s22, %s347_s23  }
  0x13   :  { %s348_s26 = smov [#allocation6]   ;;  %s295_s30 = scalar_lea.hbm %s419_s1, 2048 }
  0x14   :  { %s28_s27 = sshll.u32 %s348_s26, 4  ;;  %p296_p8 = scmp.ne.s32.totalorder %s419_s1, %s295_s30  ;;  %s29_s27 = int_to_ptr.vmem [resolvable:$true] %s28_s27 }
  0x15   :  { %p299_p9 = scmp.lt.u32.totalorder %s295_s30, %s419_s1 }
  0x17   :  { %p301_p10 = pnand %p299_p9, %p296_p8 }
  0x19   :  { %304 = shalt.err (!%p301_p10)
}
  0x1a   :  { %s305_s8 = scalar_lea.vmem %s29_s27, 2048  ;;  %p310_p12 = scmp.lt.s32.totalorder %s29_s27, %s29_s27 }
  0x1b   :  { %p306_p11 = scmp.ne.s32.totalorder %s29_s27, %s305_s8  ;;  %p311_p13 = scmp.lt.s32.totalorder %s305_s8, %s305_s8 }
  0x1d   :  { %p312_p0 = por %p311_p13, %p310_p12 }
  0x1f   :  { %p313_p1 = pnand %p312_p0, %p306_p11 }
  0x21   :  { %316 = shalt.err (!%p313_p1)
}
  0x22   :  { %34 = dma.hbm_to_vmem [thread:$0]  %s419_s1, 2048, %s29_s27, [#allocation7], %s346_s22, %s346_s22, %s347_s23  }
  0x23   :  { %339 = dma.done.wait [#allocation4], 256  }
  0x24   :  { %340 = vsyncadd [#allocation4], 4294967040 }
  0x25   :  { %341 = dma.done.wait [#allocation7], 2048  }
  0x26   :  { %342 = vsyncadd [#allocation7], 4294965248  ;;  %v53_v0 = vld [vmem:[#allocation6] sm:$0xff]  ;;  %v54_v1 = vld [vmem:[#allocation6 + $0x8] sm:$0xff]  ;;  %s349_s11 = smov [#allocation8]  }
  0x27   :  { %v55_v2 = vld [vmem:[#allocation6 + $0x10] sm:$0xff]  ;;  %v236_v3 = vpack.c.bf16 %v54_v1, %v53_v0  ;;  %v56_v4 = vld [vmem:[#allocation6 + $0x18] sm:$0xff]  ;;  %v57_v6 = vld [vmem:[#allocation6 + $0x20] sm:$0xff]  ;;  %s169_s12 = sshll.u32 %s349_s11, 4  ;;  %s170_s12 = int_to_ptr.vmem [resolvable:$true] %s169_s12 }
  0x28   :  { %v240_v5 = vpack.c.bf16 %v56_v4, %v55_v2  ;;  %v58_v7 = vld [vmem:[#allocation6 + $0x28] sm:$0xff]  ;;  %v51_v9 = vld [vmem:[#allocation3] sm:$0xff]  ;;  %v60_v11 = vld [vmem:[#allocation6 + $0x38] sm:$0xff]  ;;  %s317_s13 = scalar_lea.vmem %s170_s12, 256  ;;  %p322_p3 = scmp.lt.s32.totalorder %s170_s12, %s170_s12 }
  0x29   :  { %237 = vmatprep.subr.bf16.mxu0 %v236_v3  ;;  %v244_v8 = vpack.c.bf16 %v58_v7, %v57_v6  ;;  %v59_v10 = vld [vmem:[#allocation6 + $0x30] sm:$0xff]  ;;  %233 = vmatprep.mubr.f32.mxu0 %v51_v9  ;;  %v61_v13 = vld [vmem:[#allocation6 + $0x40] sm:$0xff]  ;;  %v62_v14 = vld [vmem:[#allocation6 + $0x48] sm:$0xff]  ;;  %p318_p2 = scmp.ne.s32.totalorder %s170_s12, %s317_s13  ;;  %p323_p4 = scmp.lt.s32.totalorder %s317_s13, %s317_s13 }
  0x2a   :  { %239 = vmatpush3.bf16.msra.mxu0 %v236_v3  ;;  %v248_v12 = vpack.c.bf16 %v60_v11, %v59_v10  ;;  %v252_v15 = vpack.c.bf16 %v62_v14, %v61_v13  ;;  %v63_v16 = vld [vmem:[#allocation6 + $0x50] sm:$0xff]  ;;  %v64_v17 = vld [vmem:[#allocation6 + $0x58] sm:$0xff]  ;;  %v65_v19 = vld [vmem:[#allocation6 + $0x60] sm:$0xff] }
  0x2b   :  { %241 = vmatprep.subr.bf16.mxu0 %v240_v5  ;;  %v256_v18 = vpack.c.bf16 %v64_v17, %v63_v16  ;;  %v66_v20 = vld [vmem:[#allocation6 + $0x68] sm:$0xff]  ;;  %v67_v22 = vld [vmem:[#allocation6 + $0x70] sm:$0xff]  ;;  %v68_v23 = vld [vmem:[#allocation6 + $0x78] sm:$0xff]  ;;  %p324_p5 = por %p323_p4, %p322_p3 }
  0x2c   :  { %v260_v21 = vpack.c.bf16 %v66_v20, %v65_v19  ;;  %v264_v24 = vpack.c.bf16 %v68_v23, %v67_v22  ;;  %v52_v25 = vld [vmem:[#allocation3 + $0x8] sm:$0xff]  ;;  %v182_v26 = vld [vmem:[%s420_s2] ss:$0 sm:$0xff] }
  0x2d   :  { %p325_p6 = pnand %p324_p5, %p318_p2 }
  0x2e   :  { %243 = vmatpush3.bf16.msra.mxu0 %v240_v5 }
  0x2f   :  { %245 = vmatprep.subr.bf16.mxu0 %v244_v8 }
  0x32   :  { %247 = vmatpush3.bf16.msra.mxu0 %v244_v8 }
  0x33   :  { %249 = vmatprep.subr.bf16.mxu0 %v248_v12 }
  0x36   :  { %251 = vmatpush3.bf16.msra.mxu0 %v248_v12 }
  0x37   :  { %253 = vmatprep.subr.bf16.mxu0 %v252_v15 }
  0x3a   :  { %255 = vmatpush3.bf16.msra.mxu0 %v252_v15 }
  0x3b   :  { %257 = vmatprep.subr.bf16.mxu0 %v256_v18 }
  0x3e   :  { %259 = vmatpush3.bf16.msra.mxu0 %v256_v18 }
  0x3f   :  { %261 = vmatprep.subr.bf16.mxu0 %v260_v21 }
  0x42   :  { %263 = vmatpush3.bf16.msra.mxu0 %v260_v21 }
  0x43   :  { %265 = vmatprep.subr.bf16.mxu0 %v264_v24 }
  0x46   :  { %267 = vmatpush3.bf16.msra.mxu0 %v264_v24 }
  0x49   :  { %234 = vmatmul.mubr.f32.vlgmr.msra.gmra.mrb[0].mxu0 %v52_v25 }
 0x11c   :  { %v235_v27 = vpop.f32.mrb[0].mxu0 }
 0x11d   :  { %v161_v28 = vadd.f32 %v235_v27, %v182_v26  ;;  %v135_v29 = vpop.f32.mrb[1].mxu0 }
 0x11e   :  { %v160_v30 = vadd.f32 %v182_v26, %v135_v29 }
 0x11f   :  { %163 = vst [vmem:[#allocation8 + $0x8] sm:$0xff] %v161_v28 }
 0x120   :  { %162 = vst [vmem:[#allocation8] sm:$0xff] %v160_v30 }
 0x121   :  { %328 = shalt.err (!%p325_p6)
}
 0x122   :  { %s329_s2 = scalar_lea.hbm %s421_s3, 256 }
 0x123   :  { %p330_p7 = scmp.ne.s32.totalorder %s421_s3, %s329_s2  ;;  %p333_p8 = scmp.lt.u32.totalorder %s329_s2, %s421_s3 }
 0x125   :  { %p335_p9 = pnand %p333_p8, %p330_p7 }
 0x127   :  { %338 = shalt.err (!%p335_p9)
}
 0x128   :  { %175 = dma.vmem_to_hbm [thread:$0]  %s170_s12, 256, %s421_s3, [#allocation5], %s346_s22, %s346_s22, %s347_s23  }
 0x129   :  { %343 = dma.done.wait [#allocation5], 256  }
 0x12a   :  { %344 = vsyncadd [#allocation5], 4294967040 }
 0x12b   :  { %179 = vsyncpa [#allocation4], 1 }
 0x12c   :  { %180 = vsyncpa [#allocation7], 1 }
 0x12d   :  { %181 = vsyncpa [#allocation5], 1 }

</bundles_post_ra>
